<compile_context>
chip_gen: v6e
topology: v6e:2x2x1
jax: 0.10.0
libtpu: 0.0.40
codegen_flags: <defaults>
</compile_context>

<pallas_src>
import jax
import jax.numpy as jnp
from jax.experimental import pallas as pl
from jax.experimental.pallas import tpu as pltpu

H1, H2 = 100, 50  # hidden widths from the PyTorch module


def _round_up(n, m):
    return ((n + m - 1) // m) * m


def _mlp_kernel(x_ref, w1_ref, b1_ref, w2_ref, b2_ref, w3_ref, b3_ref, o_ref):
    wdt = w1_ref.dtype  # compute (matmul-operand) dtype, e.g. bf16
    x = x_ref[...]
    h1 = jnp.dot(x, w1_ref[...], preferred_element_type=jnp.float32) + b1_ref[...]
    h1 = jnp.maximum(h1, 0.0)
    h2 = jnp.dot(h1.astype(wdt), w2_ref[...],
                 preferred_element_type=jnp.float32) + b2_ref[...]
    h2 = jnp.maximum(h2, 0.0)
    logits = jnp.dot(h2.astype(wdt), w3_ref[...],
                     preferred_element_type=jnp.float32) + b3_ref[...]
    o_ref[...] = logits.astype(o_ref.dtype)


def softmax_classifier_forward(x, params, *, tile_b=512,
                               compute_dtype=jnp.bfloat16):
    """x: (B, input_dim) f32. params: w1,b1,w2,b2,w3,b3 with w* as (in, out)."""
    w1, b1 = params["w1"], params["b1"]
    w2, b2 = params["w2"], params["b2"]
    w3, b3 = params["w3"], params["b3"]

    B, in_dim = x.shape
    out_dim = w3.shape[1]

    # Zero-pad layer widths (exact: zero rows/cols contribute nothing, ReLU(0)=0).
    h1p = _round_up(H1, 128)        # 100 -> 128
    h2p = _round_up(H2, 64)         # 50  -> 64
    outp = _round_up(out_dim, 128)  # 10  -> 128 (lane-dense output slab)

    pad2 = lambda a, r, c: jnp.pad(a, ((0, r - a.shape[0]), (0, c - a.shape[1])))
    w1p = pad2(w1, in_dim, h1p).astype(compute_dtype)
    w2p = pad2(w2, h1p, h2p).astype(compute_dtype)
    w3p = pad2(w3, h2p, outp).astype(compute_dtype)
    b1p = pad2(b1, 1, h1p).astype(jnp.float32)
    b2p = pad2(b2, 1, h2p).astype(jnp.float32)
    b3p = pad2(b3, 1, outp).astype(jnp.float32)

    # Batch tiling: TILE_B rows per grid step; pad batch to a tile multiple.
    tile = min(tile_b, _round_up(B, 16))
    b_pad = _round_up(B, tile)
    xp = jnp.pad(x, ((0, b_pad - B), (0, 0))).astype(compute_dtype)
    grid = (b_pad // tile,)

    resident = lambda shape: pl.BlockSpec(shape, lambda i: (0, 0))

    flops = 2 * b_pad * (in_dim * h1p + h1p * h2p + h2p * outp)
    bytes_accessed = (xp.size * xp.dtype.itemsize
                      + sum(a.size * a.dtype.itemsize
                            for a in (w1p, b1p, w2p, b2p, w3p, b3p))
                      + b_pad * outp * 4)

    out = pl.pallas_call(
        _mlp_kernel,
        out_shape=jax.ShapeDtypeStruct((b_pad, outp), jnp.float32),
        grid_spec=pltpu.PrefetchScalarGridSpec(
            num_scalar_prefetch=0,
            grid=grid,
            in_specs=[
                pl.BlockSpec((tile, in_dim), lambda i: (i, 0)),   # streamed x
                resident((in_dim, h1p)), resident((1, h1p)),
                resident((h1p, h2p)), resident((1, h2p)),
                resident((h2p, outp)), resident((1, outp)),
            ],
            out_specs=pl.BlockSpec((tile, outp), lambda i: (i, 0)),
        ),
        compiler_params=pltpu.CompilerParams(
            dimension_semantics=("parallel",)),
        cost_estimate=pl.CostEstimate(
            flops=flops, transcendentals=0, bytes_accessed=bytes_accessed),
    )(xp, w1p, b1p, w2p, b2p, w3p, b3p)

    return out[:B, :out_dim]


def init_params(key, input_dim, output_dim):
    """Deterministic init matching nn.Linear shapes (weights stored (in, out))."""
    dims = [(input_dim, H1), (H1, H2), (H2, output_dim)]
    params = {}
    for n, (din, dout) in enumerate(dims, start=1):
        key, kw, kb = jax.random.split(key, 3)
        bound = 1.0 / jnp.sqrt(din)
        params[f"w{n}"] = jax.random.uniform(
            kw, (din, dout), jnp.float32, -bound, bound)
        params[f"b{n}"] = jax.random.uniform(
            kb, (1, dout), jnp.float32, -bound, bound)
    return params


def _reference(x, p, compute_dtype=jnp.float32):
    cd = compute_dtype
    h1 = jnp.maximum(jnp.dot(x.astype(cd), p["w1"].astype(cd),
                             preferred_element_type=jnp.float32) + p["b1"], 0.0)
    h2 = jnp.maximum(jnp.dot(h1.astype(cd), p["w2"].astype(cd),
                             preferred_element_type=jnp.float32) + p["b2"], 0.0)
    return jnp.dot(h2.astype(cd), p["w3"].astype(cd),
                   preferred_element_type=jnp.float32) + p["b3"]


if __name__ == "__main__":
    key = jax.random.PRNGKey(0)
    batch, input_dim, output_dim = 256, 32, 10

    kx, kp = jax.random.split(key)
    x = jax.random.normal(kx, (batch, input_dim), jnp.float32)
    params = init_params(kp, input_dim, output_dim)

    # tile_b=128 -> grid of 2 steps; exercises the batch pipeline + padding.
    logits = softmax_classifier_forward(x, params, tile_b=128)
    logits = jax.block_until_ready(logits)

    assert logits.shape == (batch, output_dim)

    # Tight check vs a reference using the same bf16 operand rounding.
    ref_bf16 = _reference(x, params, compute_dtype=jnp.bfloat16)
    assert jnp.allclose(logits, ref_bf16, atol=1e-3, rtol=1e-3)

    # Loose sanity check vs the pure-f32 reference (bf16 operand rounding only).
    ref_f32 = _reference(x, params, compute_dtype=jnp.float32)
    assert jnp.allclose(logits, ref_f32, atol=1e-1, rtol=1e-1)

    print("KERNEL_OK")
</pallas_src>

<mosaic_0001>
module attributes {stable_mosaic.version = 11 : i64} {
  func.func @_mlp_kernel(%arg0: i32, %arg1: memref<128x32xbf16, #tpu.memory_space<vmem>>, %arg2: memref<32x128xbf16, #tpu.memory_space<vmem>>, %arg3: memref<1x128xf32, #tpu.memory_space<vmem>>, %arg4: memref<128x64xbf16, #tpu.memory_space<vmem>>, %arg5: memref<1x64xf32, #tpu.memory_space<vmem>>, %arg6: memref<64x128xbf16, #tpu.memory_space<vmem>>, %arg7: memref<1x128xf32, #tpu.memory_space<vmem>>, %arg8: memref<128x128xf32, #tpu.memory_space<vmem>>) attributes {dimension_semantics = [#tpu.dimension_semantics<parallel>], iteration_bounds = array<i64: 2>, scalar_prefetch = 0 : i64, scratch_operands = 0 : i64, tpu.core_type = #tpu.core_type<tc>, window_params = [{transform_indices = @transform_0, window_bounds = array<i64: 128, 32>}, {pipeline_mode = #tpu.pipeline_mode<synchronous>, transform_indices = @transform_1, window_bounds = array<i64: 32, 128>}, {pipeline_mode = #tpu.pipeline_mode<synchronous>, transform_indices = @transform_2, window_bounds = array<i64: 1, 128>}, {pipeline_mode = #tpu.pipeline_mode<synchronous>, transform_indices = @transform_3, window_bounds = array<i64: 128, 64>}, {pipeline_mode = #tpu.pipeline_mode<synchronous>, transform_indices = @transform_4, window_bounds = array<i64: 1, 64>}, {pipeline_mode = #tpu.pipeline_mode<synchronous>, transform_indices = @transform_5, window_bounds = array<i64: 64, 128>}, {pipeline_mode = #tpu.pipeline_mode<synchronous>, transform_indices = @transform_6, window_bounds = array<i64: 1, 128>}, {transform_indices = @transform_7, window_bounds = array<i64: 128, 128>}]} {
    %c0 = arith.constant 0 : index
    %c0_0 = arith.constant 0 : index
    %0 = vector.load %arg1[%c0, %c0_0] : memref<128x32xbf16, #tpu.memory_space<vmem>>, vector<128x32xbf16>
    %c0_1 = arith.constant 0 : index
    %c0_2 = arith.constant 0 : index
    %1 = vector.load %arg2[%c0_1, %c0_2] : memref<32x128xbf16, #tpu.memory_space<vmem>>, vector<32x128xbf16>
    %cst = arith.constant dense<0.000000e+00> : vector<128x128xf32>
    %2 = tpu.matmul %0, %1, %cst {dimension_numbers = #tpu.dot_dimension_numbers<[1], [0], [0], [1], [0, 0, 1, 1], [], []>} : vector<128x32xbf16>, vector<32x128xbf16>, vector<128x128xf32> -> vector<128x128xf32>
    %c0_3 = arith.constant 0 : index
    %c0_4 = arith.constant 0 : index
    %3 = vector.load %arg3[%c0_3, %c0_4] : memref<1x128xf32, #tpu.memory_space<vmem>>, vector<1x128xf32>
    %4 = vector.broadcast %3 : vector<1x128xf32> to vector<128x128xf32>
    %5 = arith.addf %2, %4 : vector<128x128xf32>
    %cst_5 = arith.constant 0.000000e+00 : f32
    %6 = vector.broadcast %cst_5 : f32 to vector<128x128xf32>
    %7 = arith.maximumf %5, %6 : vector<128x128xf32>
    %8 = arith.truncf %7 : vector<128x128xf32> to vector<128x128xbf16>
    %c0_6 = arith.constant 0 : index
    %c0_7 = arith.constant 0 : index
    %9 = vector.load %arg4[%c0_6, %c0_7] : memref<128x64xbf16, #tpu.memory_space<vmem>>, vector<128x64xbf16>
    %cst_8 = arith.constant dense<0.000000e+00> : vector<128x64xf32>
    %10 = tpu.matmul %8, %9, %cst_8 {dimension_numbers = #tpu.dot_dimension_numbers<[1], [0], [0], [1], [0, 0, 1, 1], [], []>} : vector<128x128xbf16>, vector<128x64xbf16>, vector<128x64xf32> -> vector<128x64xf32>
    %c0_9 = arith.constant 0 : index
    %c0_10 = arith.constant 0 : index
    %11 = vector.load %arg5[%c0_9, %c0_10] : memref<1x64xf32, #tpu.memory_space<vmem>>, vector<1x64xf32>
    %12 = vector.broadcast %11 : vector<1x64xf32> to vector<128x64xf32>
    %13 = arith.addf %10, %12 : vector<128x64xf32>
    %cst_11 = arith.constant 0.000000e+00 : f32
    %14 = vector.broadcast %cst_11 : f32 to vector<128x64xf32>
    %15 = arith.maximumf %13, %14 : vector<128x64xf32>
    %16 = arith.truncf %15 : vector<128x64xf32> to vector<128x64xbf16>
    %c0_12 = arith.constant 0 : index
    %c0_13 = arith.constant 0 : index
    %17 = vector.load %arg6[%c0_12, %c0_13] : memref<64x128xbf16, #tpu.memory_space<vmem>>, vector<64x128xbf16>
    %cst_14 = arith.constant dense<0.000000e+00> : vector<128x128xf32>
    %18 = tpu.matmul %16, %17, %cst_14 {dimension_numbers = #tpu.dot_dimension_numbers<[1], [0], [0], [1], [0, 0, 1, 1], [], []>} : vector<128x64xbf16>, vector<64x128xbf16>, vector<128x128xf32> -> vector<128x128xf32>
    %c0_15 = arith.constant 0 : index
    %c0_16 = arith.constant 0 : index
    %19 = vector.load %arg7[%c0_15, %c0_16] : memref<1x128xf32, #tpu.memory_space<vmem>>, vector<1x128xf32>
    %20 = vector.broadcast %19 : vector<1x128xf32> to vector<128x128xf32>
    %21 = arith.addf %18, %20 : vector<128x128xf32>
    %c0_17 = arith.constant 0 : index
    %c0_18 = arith.constant 0 : index
    %22 = vector.load %arg8[%c0_17, %c0_18] : memref<128x128xf32, #tpu.memory_space<vmem>>, vector<128x128xf32>
    tpu.vector_store %arg8[%c0_17, %c0_18], %21 {strides = array<i32>} : memref<128x128xf32, #tpu.memory_space<vmem>>, vector<128x128xf32>,
    return
  }
  func.func @transform_0(%arg0: i32) -> (i32, i32) {
    %c0_i32 = arith.constant 0 : i32
    %c0_i32_0 = arith.constant 0 : i32
    return %arg0, %c0_i32 : i32, i32
  }
  func.func @transform_1(%arg0: i32) -> (i32, i32) {
    %c0_i32 = arith.constant 0 : i32
    %c0_i32_0 = arith.constant 0 : i32
    %c0_i32_1 = arith.constant 0 : i32
    return %c0_i32, %c0_i32_0 : i32, i32
  }
  func.func @transform_2(%arg0: i32) -> (i32, i32) {
    %c0_i32 = arith.constant 0 : i32
    %c0_i32_0 = arith.constant 0 : i32
    %c0_i32_1 = arith.constant 0 : i32
    return %c0_i32, %c0_i32_0 : i32, i32
  }
  func.func @transform_3(%arg0: i32) -> (i32, i32) {
    %c0_i32 = arith.constant 0 : i32
    %c0_i32_0 = arith.constant 0 : i32
    %c0_i32_1 = arith.constant 0 : i32
    return %c0_i32, %c0_i32_0 : i32, i32
  }
  func.func @transform_4(%arg0: i32) -> (i32, i32) {
    %c0_i32 = arith.constant 0 : i32
    %c0_i32_0 = arith.constant 0 : i32
    %c0_i32_1 = arith.constant 0 : i32
    return %c0_i32, %c0_i32_0 : i32, i32
  }
  func.func @transform_5(%arg0: i32) -> (i32, i32) {
    %c0_i32 = arith.constant 0 : i32
    %c0_i32_0 = arith.constant 0 : i32
    %c0_i32_1 = arith.constant 0 : i32
    return %c0_i32, %c0_i32_0 : i32, i32
  }
  func.func @transform_6(%arg0: i32) -> (i32, i32) {
    %c0_i32 = arith.constant 0 : i32
    %c0_i32_0 = arith.constant 0 : i32
    %c0_i32_1 = arith.constant 0 : i32
    return %c0_i32, %c0_i32_0 : i32, i32
  }
  func.func @transform_7(%arg0: i32) -> (i32, i32) {
    %c0_i32 = arith.constant 0 : i32
    %c0_i32_0 = arith.constant 0 : i32
    return %arg0, %c0_i32 : i32, i32
  }
}

</mosaic_0001>

<bundles_post_ra>
// kernel: tpu_custom_call.1
= control target key start
LH: loop header
LB: loop body
LE: loop exit
PB: predicated region body
PF: predicated region fallthrough
CT: control target
= control target key end

     0   :  { %12 = vsyncpa [#allocation3], 0  ;;  %s1478_s0 = inlined_call_operand.vmem [shape: bf16[256,32], index: 0, kind: input, shape index: {}]   ;;  %s1479_s1 = inlined_call_operand.vmem [shape: bf16[32,128], index: 1, kind: input, shape index: {}]   ;;  %s1480_s2 = inlined_call_operand.vmem [shape: f32[1,128], index: 2, kind: input, shape index: {}]   ;;  %s1481_s3 = inlined_call_operand.vmem [shape: bf16[128,64], index: 3, kind: input, shape index: {}]   ;;  %s1482_s4 = inlined_call_operand.vmem [shape: f32[1,64], index: 4, kind: input, shape index: {}]   ;;  %s1483_s5 = inlined_call_operand.vmem [shape: bf16[64,128], index: 5, kind: input, shape index: {}]   ;;  %s1484_s6 = inlined_call_operand.vmem [shape: f32[1,128], index: 6, kind: input, shape index: {}]   ;;  %s1485_s7 = inlined_call_operand.hbm [shape: f32[256,128], index: 7, kind: output, shape index: {}]  }
   0x1   :  { %14 = vsyncpa [#allocation3 + $0x1], 0  ;;  %s1287_s24 = smov 0   ;;  %s1289_s25 = smov 0  }
   0x2   :  { %s1291_s26 = smov 0   ;;  %s1293_s27 = smov 0  }
   0x3 LB: > { %s1308_s28 = sadd.s32 4294967295, %s1242_s27   ;;  %s951_s29 = sadd.s32 4294967294, %s1242_s27   ;;  %s1242_s27 = sphi %s1293_s27, %s1491_s27   ;;  %s1238_s26 = sphi %s1291_s26, %s1490_s26   ;;  %s1234_s25 = sphi %s1289_s25, %s1489_s25   ;;  %s1230_s24 = sphi %s1287_s24, %s1488_s24  }
   0x4   : > { %s1312_s30 = sadd.s32 1, %s1242_s27   ;;  %s179_s8 = sadd.s32 1, %s1238_s26 }
   0x5   : > { %s176_s9 = ssub.s32 %s1242_s27, %s1312_s30  ;;  %p189_p0 = scmp.ne.s32.totalorder %s1238_s26, %s1234_s25 }
   0x6   : > { %p177_p1 = scmp.eq.s32.totalorder %s176_s9, 0  ;;  %p190_p2 = scmp.eq.s32.totalorder %s1308_s28, 1 }
   0x7   : > { %p195_p3 = scmp.ne.s32.totalorder %s1234_s25, %s1230_s24  ;;  %p196_p4 = scmp.eq.s32.totalorder %s951_s29, 1 }
   0x8   : > { %s1323_s10 = scalar_select %p177_p1, %s1238_s26, %s179_s8  }
   0x9   : > { %p1325_p5 = por %p190_p2, %p189_p0  ;;  %p1329_p6 = por %p196_p4, %p195_p3 }
   0xa   : > { %p954_p7 = scmp.ge.s32.totalorder %s1242_s27, 1  ;;  %p241_p8 = scmp.lt.s32.totalorder %s1242_s27, 3 }
   0xc   : > { %p242_p9 = pnand %p954_p7, %p241_p8 }
   0xd   : > { %s956_s15 = sshll.u32 (!%p242_p9), %s1308_s28, 4  ;;  %s1004_s13 = sshll.u32 (!%p242_p9), %s1308_s28, 11 }
   0xe   : > { %245 = sbr.rel (%p242_p9) target bundleno = 679 (0x2a7), region = 48  ;;  %p274_p10 = scmp.lt.s32.totalorder (!%p242_p9), %s956_s15, 31 }
   0xf   : > { %s1430_s17 = scalar_lea.hbm (!%p242_p9), %s1485_s7, %s1004_s13  ;;  %s1244_s19 = smov (!%p242_p9), [#allocation2]  }
  0x10   : > { %s1186_s20 = sshll.u32 (!%p242_p9), %s1244_s19, 4  ;;  %s1187_s20 = int_to_ptr.vmem [resolvable:$false] %s1186_s20 }
  0x11   : > { %s1188_s21 = scalar_lea.vmem (!%p242_p9), %s1187_s20, 4096 }
  0x13   : > { %v1160_v0 = vld [vmem:[%s1479_s1 + $0x8] sm:$0xff]   ;;  %v1161_v1 = vld [vmem:[%s1479_s1] sm:$0xff]   ;;  %v1170_v2 = vld [vmem:[%s1481_s3 + $0x38] sm:$0xff]   ;;  %s1493_s15 = smov (!%p274_p10, %s956_s15), 31  ;;  %vm360_vm0 = vcmask 261120   ;;  %vm737_vm1 = vcmask 523264  }
  0x14   : > { %1043 = vmatprep.subr.bf16.mxu0 %v1160_v0  ;;  %v1171_v3 = vld [vmem:[%s1481_s3 + $0x30] sm:$0xff]   ;;  %1063 = vmatprep.subr.bf16.mxu1 %v1170_v2  ;;  %s957_s22 = sshll.u32 %s1493_s15, 2  ;;  %v1172_v4 = vld [vmem:[%s1481_s3 + $0x28] sm:$0xff]   ;;  %v1173_v8 = vld [vmem:[%s1481_s3 + $0x20] sm:$0xff]  }
  0x15   : > { %1044 = vmatpush3.bf16.msra.mxu0 %v1160_v0  ;;  %1064 = vmatpush3.bf16.msra.mxu1 %v1170_v2  ;;  %s277_s8 = scalar_lea.vmem %s1478_s0, %s957_s22  ;;  %v1174_v9 = vld [vmem:[%s1481_s3 + $0x18] sm:$0xff]   ;;  %v1175_v15 = vld [vmem:[%s1481_s3 + $0x10] sm:$0xff]   ;;  %v1176_v16 = vld [vmem:[%s1481_s3 + $0x8] sm:$0xff]   ;;  %s270_s22 = sand.u32 1, %s1234_s25  }
  0x16   : > { %1045 = vmatprep.subr.bf16.mxu0 %v1161_v1  ;;  %1065 = vmatprep.subr.bf16.mxu1 %v1171_v3  ;;  %v1162_v5 = vld [vmem:[%s277_s8] sm:$0xff]   ;;  %v1163_v6 = vld [vmem:[%s277_s8 + $0x8] sm:$0xff]   ;;  %v1164_v7 = vld [vmem:[%s277_s8 + $0x10] sm:$0xff]   ;;  %s955_s23 = sshll.u32 %s270_s22, 7  ;;  %s1438_s28 = scalar_lea.sflag [#allocation3], %s270_s22 }
  0x17   : > { %1047 = vmatprep.mubr.msk.bf16.mxu0 %vm360_vm0, %v1162_v5  ;;  %v1165_v10 = vld [vmem:[%s277_s8 + $0x18] sm:$0xff]   ;;  %v1166_v11 = vld [vmem:[%s277_s8 + $0x20] sm:$0xff]   ;;  %v1167_v12 = vld [vmem:[%s277_s8 + $0x28] sm:$0xff]   ;;  %s1409_s9 = scalar_lea.vmem [#allocation2], %s955_s23 }
  0x18   : > { %v1168_v13 = vld [vmem:[%s277_s8 + $0x30] sm:$0xff]   ;;  %v1169_v14 = vld [vmem:[%s277_s8 + $0x38] sm:$0xff]   ;;  %v1177_v17 = vld [vmem:[%s1481_s3] sm:$0xff]   ;;  %s889_s14 = sshll.u32 %s1409_s9, 4  ;;  %s1432_s14 = int_to_ptr.vmem [resolvable:$true] %s889_s14 }
  0x19   : > { %1046 = vmatpush3.bf16.msra.mxu0 %v1161_v1  ;;  %1066 = vmatpush3.bf16.msra.mxu1 %v1171_v3  ;;  %v1178_v18 = vld [vmem:[%s1483_s5 + $0x18] sm:$0xff]   ;;  %v1179_v19 = vld [vmem:[%s1483_s5 + $0x10] sm:$0xff]   ;;  %v1180_v20 = vld [vmem:[%s1483_s5 + $0x8] sm:$0xff]   ;;  %s1182_s18 = scalar_lea.vmem %s1432_s14, 2048  ;;  %p1189_p0 = scmp.lt.s32.totalorder %s1432_s14, %s1187_s20 }
  0x1a   : > { %1067 = vmatprep.subr.bf16.mxu1 %v1172_v4  ;;  %1095 = vmatprep.subr.bf16.mxu0 %v1178_v18  ;;  %v958_v23 = vld [vmem:[%s1480_s2] ss:$0 sm:$0xff]  ;;  %p1183_p11 = scmp.ne.s32.totalorder %s1432_s14, %s1182_s18  ;;  %p1190_p1 = scmp.lt.s32.totalorder %s1188_s21, %s1182_s18 }
  0x1c   : > { %1048 = vmatmul.mubr.msk.bf16.vlgmr.msra.gmra.mxu0 %vm360_vm0, %v1163_v6  ;;  %p1184_p12 = pnand %p1183_p11, %p1325_p5  ;;  %p1191_p2 = por %p1190_p1, %p1189_p0 }
  0x1d   : > { %1051 = vmatprep.mubr.msk.bf16.mxu0 %vm360_vm0, %v1164_v7  ;;  %1068 = vmatpush3.bf16.msra.mxu1 %v1172_v4 }
  0x1e   : > { %1069 = vmatprep.subr.bf16.mxu1 %v1173_v8  ;;  %1096 = vmatpush3.bf16.msra.mxu0 %v1178_v18  ;;  %p1185_p13 = pneg %p1184_p12 }
  0x1f   : > { %1097 = vmatprep.subr.bf16.mxu0 %v1179_v19 }
  0x20   : > { %p1192_p3 = pnand %p1191_p2, %p1185_p13 }
  0x21   : > { %1070 = vmatpush3.bf16.msra.mxu1 %v1173_v8 }
  0x22   : > { %1071 = vmatprep.subr.bf16.mxu1 %v1174_v9  ;;  %1098 = vmatpush3.bf16.msra.mxu0 %v1179_v19 }
  0x23   : > { %1099 = vmatprep.subr.bf16.mxu0 %v1180_v20 }
  0x24   : > { %1052 = vmatmul.mubr.msk.bf16.gmra.mxu0 %vm360_vm0, %v1165_v10 }
  0x25   : > { %1055 = vmatprep.mubr.msk.bf16.mxu0 %vm360_vm0, %v1166_v11  ;;  %1072 = vmatpush3.bf16.msra.mxu1 %v1174_v9 }
  0x26   : > { %1073 = vmatprep.subr.bf16.mxu1 %v1175_v15  ;;  %1100 = vmatpush3.bf16.msra.mxu0 %v1180_v20 }
  0x29   : > { %1074 = vmatpush3.bf16.msra.mxu1 %v1175_v15 }
  0x2a   : > { %1075 = vmatprep.subr.bf16.mxu1 %v1176_v16 }
  0x2c   : > { %1056 = vmatmul.mubr.msk.bf16.gmra.mxu0 %vm360_vm0, %v1167_v12 }
  0x2d   : > { %1059 = vmatprep.mubr.msk.bf16.mxu0 %vm360_vm0, %v1168_v13  ;;  %1076 = vmatpush3.bf16.msra.mxu1 %v1176_v16 }
  0x2e   : > { %1077 = vmatprep.subr.bf16.mxu1 %v1177_v17 }
  0x31   : > { %1078 = vmatpush3.bf16.msra.mxu1 %v1177_v17  ;;  %v977_v17 = vld [vmem:[%s1482_s4] ss:$0 sm:$0xff] }
  0x34   : > { %1060 = vmatmul.mubr.msk.bf16.gmra.mxu0 %vm360_vm0, %v1169_v14  ;;  %v1181_v14 = vld [vmem:[%s1483_s5] sm:$0xff]  }
  0x35   : > { %1101 = vmatprep.subr.bf16.mxu0 %v1181_v14 }
  0x36   : > { %1102 = vmatpush3.bf16.msra.mxu0 %v1181_v14 }
  0xdc   : > { %v1049_v21 = vpop.f32.mrf.mxu0 }
  0xdd   : > { %v428_v27 = vadd.f32 %v1049_v21, %v958_v23 }
  0xde   : > { %v419_v22 = vpop.f32.mrf.mxu0 }
  0xdf   : > { %v420_v25 = vadd.f32 %v958_v23, %v419_v22  ;;  %v484_v34 = vmax.f32 %v428_v27, 0.0 }
  0xe0   : > { %v1050_v24 = vpop.f32.mrf.mxu0 }
  0xe1   : > { %v431_v26 = vadd.f32 %v1050_v24, %v958_v23  ;;  %v482_v32 = vmax.f32 %v420_v25, 0.0 }
  0xe2   : > { %v422_v28 = vpop.f32.mrf.mxu0 }
  0xe3   : > { %v423_v29 = vadd.f32 %v958_v23, %v422_v28  ;;  %v485_v30 = vmax.f32 %v431_v26, 0.0 }
  0xe4   : > { %v1053_v31 = vpop.f32.mrf.mxu0 }
  0xe5   : > { %v483_v33 = vmax.f32 %v423_v29, 0.0  ;;  %v499_v37 = vpack.c.bf16 %v485_v30, %v484_v34  ;;  %v444_v41 = vadd.f32 %v1053_v31, %v958_v23 }
  0xe6   : > { %v435_v35 = vpop.f32.mrf.mxu0 }
  0xe7   : > { %v498_v36 = vpack.c.bf16 %v483_v33, %v482_v32  ;;  %v436_v39 = vadd.f32 %v958_v23, %v435_v35  ;;  %v488_v48 = vmax.f32 %v444_v41, 0.0 }
  0xe8   : > { %v1054_v38 = vpop.f32.mrf.mxu0 }
  0xe9   : > { %v447_v40 = vadd.f32 %v1054_v38, %v958_v23  ;;  %1079 = vmatprep.mubr.bf16.mxu1 %v498_v36  ;;  %v486_v46 = vmax.f32 %v436_v39, 0.0 }
  0xea   : > { %v438_v42 = vpop.f32.mrf.mxu0  ;;  %1080 = vmatmul.mubr.bf16.vlgmr.msra.gmra.mxu1 %v499_v37 }
  0xeb   : > { %v439_v43 = vadd.f32 %v958_v23, %v438_v42  ;;  %v489_v44 = vmax.f32 %v447_v40, 0.0 }
  0xec   : > { %v1057_v45 = vpop.f32.mrf.mxu0 }
  0xed   : > { %v487_v47 = vmax.f32 %v439_v43, 0.0  ;;  %v501_v51 = vpack.c.bf16 %v489_v44, %v488_v48  ;;  %v460_v55 = vadd.f32 %v1057_v45, %v958_v23 }
  0xee   : > { %v451_v49 = vpop.f32.mrf.mxu0 }
  0xef   : > { %v500_v50 = vpack.c.bf16 %v487_v47, %v486_v46  ;;  %v452_v53 = vadd.f32 %v958_v23, %v451_v49  ;;  %v492_v62 = vmax.f32 %v460_v55, 0.0 }
  0xf0   : > { %v1058_v52 = vpop.f32.mrf.mxu0 }
  0xf1   : > { %v463_v54 = vadd.f32 %v1058_v52, %v958_v23  ;;  %1083 = vmatprep.mubr.bf16.mxu1 %v500_v50  ;;  %v490_v60 = vmax.f32 %v452_v53, 0.0 }
  0xf2   : > { %v454_v56 = vpop.f32.mrf.mxu0  ;;  %1084 = vmatmul.mubr.bf16.gmra.mxu1 %v501_v51 }
  0xf3   : > { %v455_v57 = vadd.f32 %v958_v23, %v454_v56  ;;  %v493_v58 = vmax.f32 %v463_v54, 0.0 }
  0xf4   : > { %v1061_v59 = vpop.f32.mrf.mxu0 }
  0xf5   : > { %v491_v61 = vmax.f32 %v455_v57, 0.0  ;;  %v503_v1 = vpack.c.bf16 %v493_v58, %v492_v62  ;;  %v476_v5 = vadd.f32 %v1061_v59, %v958_v23 }
  0xf6   : > { %v467_v63 = vpop.f32.mrf.mxu0 }
  0xf7   : > { %v502_v0 = vpack.c.bf16 %v491_v61, %v490_v60  ;;  %v468_v3 = vadd.f32 %v958_v23, %v467_v63  ;;  %v496_v11 = vmax.f32 %v476_v5, 0.0 }
  0xf8   : > { %v1062_v2 = vpop.f32.mrf.mxu0 }
  0xf9   : > { %v479_v4 = vadd.f32 %v1062_v2, %v958_v23  ;;  %1087 = vmatprep.mubr.bf16.mxu1 %v502_v0  ;;  %v494_v9 = vmax.f32 %v468_v3, 0.0 }
  0xfa   : > { %v470_v6 = vpop.f32.mrf.mxu0  ;;  %1088 = vmatmul.mubr.bf16.gmra.mxu1 %v503_v1 }
  0xfb   : > { %v471_v7 = vadd.f32 %v958_v23, %v470_v6  ;;  %v497_v8 = vmax.f32 %v479_v4, 0.0 }
  0xfd   : > { %v495_v10 = vmax.f32 %v471_v7, 0.0  ;;  %v505_v13 = vpack.c.bf16 %v497_v8, %v496_v11  ;;  %v986_v8 = vld [vmem:[%s1484_s6] ss:$0 sm:$0xff] }
  0xff   : > { %v504_v12 = vpack.c.bf16 %v495_v10, %v494_v9 }
 0x101   : > { %1091 = vmatprep.mubr.bf16.mxu1 %v504_v12 }
 0x102   : > { %1092 = vmatmul.mubr.bf16.gmra.mxu1 %v505_v13 }
 0x1aa   : > { %v1081_v15 = vpop.f32.mrf.mxu1 }
 0x1ab   : > { %v620_v21 = vadd.f32 %v1081_v15, %v977_v17 }
 0x1ac   : > { %v611_v16 = vpop.f32.mrf.mxu1 }
 0x1ad   : > { %v612_v19 = vadd.f32 %v977_v17, %v611_v16  ;;  %v676_v28 = vmax.f32 %v620_v21, 0.0 }
 0x1ae   : > { %v1082_v18 = vpop.f32.mrf.mxu1 }
 0x1af   : > { %v623_v20 = vadd.f32 %v1082_v18, %v977_v17  ;;  %v674_v26 = vmax.f32 %v612_v19, 0.0 }
 0x1b0   : > { %v614_v22 = vpop.f32.mrf.mxu1 }
 0x1b1   : > { %v615_v23 = vadd.f32 %v977_v17, %v614_v22  ;;  %v677_v24 = vmax.f32 %v623_v20, 0.0 }
 0x1b2   : > { %v1085_v25 = vpop.f32.mrf.mxu1 }
 0x1b3   : > { %v675_v27 = vmax.f32 %v615_v23, 0.0  ;;  %v691_v31 = vpack.c.bf16 %v677_v24, %v676_v28  ;;  %v636_v35 = vadd.f32 %v1085_v25, %v977_v17 }
 0x1b4   : > { %v627_v29 = vpop.f32.mrf.mxu1 }
 0x1b5   : > { %v690_v30 = vpack.c.bf16 %v675_v27, %v674_v26  ;;  %v628_v33 = vadd.f32 %v977_v17, %v627_v29  ;;  %v680_v42 = vmax.f32 %v636_v35, 0.0 }
 0x1b6   : > { %v1086_v32 = vpop.f32.mrf.mxu1 }
 0x1b7   : > { %v639_v34 = vadd.f32 %v1086_v32, %v977_v17  ;;  %1103 = vmatprep.mubr.msk.bf16.mxu0 %vm737_vm1, %v690_v30  ;;  %v678_v40 = vmax.f32 %v628_v33, 0.0 }
 0x1b8   : > { %v630_v36 = vpop.f32.mrf.mxu1  ;;  %1104 = vmatmul.mubr.msk.bf16.vlgmr.msra.gmra.mxu0 %vm737_vm1, %v691_v31 }
 0x1b9   : > { %v631_v37 = vadd.f32 %v977_v17, %v630_v36  ;;  %v681_v38 = vmax.f32 %v639_v34, 0.0 }
 0x1ba   : > { %v1089_v39 = vpop.f32.mrf.mxu1 }
 0x1bb   : > { %v679_v41 = vmax.f32 %v631_v37, 0.0  ;;  %v693_v45 = vpack.c.bf16 %v681_v38, %v680_v42  ;;  %v652_v49 = vadd.f32 %v1089_v39, %v977_v17 }
 0x1bc   : > { %v643_v43 = vpop.f32.mrf.mxu1 }
 0x1bd   : > { %v692_v44 = vpack.c.bf16 %v679_v41, %v678_v40  ;;  %v644_v47 = vadd.f32 %v977_v17, %v643_v43  ;;  %v684_v56 = vmax.f32 %v652_v49, 0.0 }
 0x1be   : > { %v1090_v46 = vpop.f32.mrf.mxu1 }
 0x1bf   : > { %v655_v48 = vadd.f32 %v1090_v46, %v977_v17  ;;  %1107 = vmatprep.mubr.msk.bf16.mxu0 %vm737_vm1, %v692_v44  ;;  %v682_v54 = vmax.f32 %v644_v47, 0.0 }
 0x1c0   : > { %v646_v50 = vpop.f32.mrf.mxu1  ;;  %1108 = vmatmul.mubr.msk.bf16.gmra.mxu0 %vm737_vm1, %v693_v45 }
 0x1c1   : > { %v647_v51 = vadd.f32 %v977_v17, %v646_v50  ;;  %v685_v52 = vmax.f32 %v655_v48, 0.0 }
 0x1c2   : > { %v1093_v53 = vpop.f32.mrf.mxu1 }
 0x1c3   : > { %v683_v55 = vmax.f32 %v647_v51, 0.0  ;;  %v695_v59 = vpack.c.bf16 %v685_v52, %v684_v56  ;;  %v668_v63 = vadd.f32 %v1093_v53, %v977_v17 }
 0x1c4   : > { %v659_v57 = vpop.f32.mrf.mxu1 }
 0x1c5   : > { %v694_v58 = vpack.c.bf16 %v683_v55, %v682_v54  ;;  %v660_v61 = vadd.f32 %v977_v17, %v659_v57  ;;  %v688_v5 = vmax.f32 %v668_v63, 0.0 }
 0x1c6   : > { %v1094_v60 = vpop.f32.mrf.mxu1 }
 0x1c7   : > { %v671_v62 = vadd.f32 %v1094_v60, %v977_v17  ;;  %1111 = vmatprep.mubr.msk.bf16.mxu0 %vm737_vm1, %v694_v58  ;;  %v686_v3 = vmax.f32 %v660_v61, 0.0 }
 0x1c8   : > { %v662_v0 = vpop.f32.mrf.mxu1  ;;  %1112 = vmatmul.mubr.msk.bf16.gmra.mxu0 %vm737_vm1, %v695_v59 }
 0x1c9   : > { %v663_v1 = vadd.f32 %v977_v17, %v662_v0  ;;  %v689_v2 = vmax.f32 %v671_v62, 0.0 }
 0x1cb   : > { %v687_v4 = vmax.f32 %v663_v1, 0.0  ;;  %v697_v7 = vpack.c.bf16 %v689_v2, %v688_v5 }
 0x1cd   : > { %v696_v6 = vpack.c.bf16 %v687_v4, %v686_v3 }
 0x1cf   : > { %1115 = vmatprep.mubr.msk.bf16.mxu0 %vm737_vm1, %v696_v6 }
 0x1d0   : > { %1116 = vmatmul.mubr.msk.bf16.gmra.mxu0 %vm737_vm1, %v697_v7 }
 0x278   : > { %v1105_v9 = vpop.f32.mrf.mxu0 }
 0x279   : > { %v805_v10 = vadd.f32 %v1105_v9, %v986_v8 }
 0x27a   : > { %v796_v11 = vpop.f32.mrf.mxu0 }
 0x27b   : > { %861 = vst [vmem:[%s1409_s9 + $0x10] sm:$0xff] %v805_v10  ;;  %v797_v12 = vadd.f32 %v986_v8, %v796_v11 }
 0x27c   : > { %v1106_v13 = vpop.f32.mrf.mxu0 }
 0x27d   : > { %859 = vst [vmem:[%s1409_s9] sm:$0xff] %v797_v12  ;;  %v808_v14 = vadd.f32 %v1106_v13, %v986_v8 }
 0x27e   : > { %v799_v15 = vpop.f32.mrf.mxu0 }
 0x27f   : > { %862 = vst [vmem:[%s1409_s9 + $0x18] sm:$0xff] %v808_v14  ;;  %v800_v16 = vadd.f32 %v986_v8, %v799_v15 }
 0x280   : > { %v1109_v17 = vpop.f32.mrf.mxu0 }
 0x281   : > { %860 = vst [vmem:[%s1409_s9 + $0x8] sm:$0xff] %v800_v16  ;;  %v821_v18 = vadd.f32 %v1109_v17, %v986_v8 }
 0x282   : > { %v812_v19 = vpop.f32.mrf.mxu0 }
 0x283   : > { %865 = vst [vmem:[%s1409_s9 + $0x30] sm:$0xff] %v821_v18  ;;  %v813_v20 = vadd.f32 %v986_v8, %v812_v19 }
 0x284   : > { %v1110_v21 = vpop.f32.mrf.mxu0 }
 0x285   : > { %863 = vst [vmem:[%s1409_s9 + $0x20] sm:$0xff] %v813_v20  ;;  %v824_v22 = vadd.f32 %v1110_v21, %v986_v8 }
 0x286   : > { %v815_v23 = vpop.f32.mrf.mxu0 }
 0x287   : > { %866 = vst [vmem:[%s1409_s9 + $0x38] sm:$0xff] %v824_v22  ;;  %v816_v24 = vadd.f32 %v986_v8, %v815_v23 }
 0x288   : > { %v1113_v25 = vpop.f32.mrf.mxu0 }
 0x289   : > { %864 = vst [vmem:[%s1409_s9 + $0x28] sm:$0xff] %v816_v24  ;;  %v837_v26 = vadd.f32 %v1113_v25, %v986_v8 }
 0x28a   : > { %v828_v27 = vpop.f32.mrf.mxu0 }
 0x28b   : > { %869 = vst [vmem:[%s1409_s9 + $0x50] sm:$0xff] %v837_v26  ;;  %v829_v28 = vadd.f32 %v986_v8, %v828_v27 }
 0x28c   : > { %v1114_v29 = vpop.f32.mrf.mxu0 }
 0x28d   : > { %867 = vst [vmem:[%s1409_s9 + $0x40] sm:$0xff] %v829_v28  ;;  %v840_v30 = vadd.f32 %v1114_v29, %v986_v8 }
 0x28e   : > { %v831_v31 = vpop.f32.mrf.mxu0 }
 0x28f   : > { %870 = vst [vmem:[%s1409_s9 + $0x58] sm:$0xff] %v840_v30  ;;  %v832_v32 = vadd.f32 %v986_v8, %v831_v31 }
 0x290   : > { %v1117_v33 = vpop.f32.mrf.mxu0 }
 0x291   : > { %868 = vst [vmem:[%s1409_s9 + $0x48] sm:$0xff] %v832_v32  ;;  %v853_v34 = vadd.f32 %v1117_v33, %v986_v8 }
 0x292   : > { %v844_v35 = vpop.f32.mrf.mxu0 }
 0x293   : > { %873 = vst [vmem:[%s1409_s9 + $0x70] sm:$0xff] %v853_v34  ;;  %v845_v36 = vadd.f32 %v986_v8, %v844_v35 }
 0x294   : > { %v1118_v37 = vpop.f32.mrf.mxu0 }
 0x295   : > { %871 = vst [vmem:[%s1409_s9 + $0x60] sm:$0xff] %v845_v36  ;;  %v856_v38 = vadd.f32 %v1118_v37, %v986_v8 }
 0x296   : > { %v847_v39 = vpop.f32.mrf.mxu0 }
 0x297   : > { %874 = vst [vmem:[%s1409_s9 + $0x78] sm:$0xff] %v856_v38  ;;  %v848_v40 = vadd.f32 %v986_v8, %v847_v39 }
 0x299   : > { %872 = vst [vmem:[%s1409_s9 + $0x68] sm:$0xff] %v848_v40 }
 0x29a   : > { %1195 = shalt.err (!%p1192_p3)
}
 0x29b   : > { %s1196_s22 = scalar_lea.hbm %s1430_s17, 2048  ;;  %s1200_s8 = scalar_lea.hbm %s1485_s7, 4096 }
 0x29c   : > { %p1197_p4 = scmp.ne.s32.totalorder %s1430_s17, %s1196_s22  ;;  %p1201_p9 = scmp.lt.s32.totalorder %s1430_s17, %s1485_s7 }
 0x29d   : > { %p1202_p10 = scmp.lt.s32.totalorder %s1200_s8, %s1196_s22 }
 0x29e   : > { %p1198_p7 = pnand %p1197_p4, %p1325_p5 }
 0x29f   : > { %p1203_p11 = por %p1202_p10, %p1201_p9 }
 0x2a0   : > { %p1199_p8 = pneg %p1198_p7 }
 0x2a2   : > { %p1204_p12 = pnand %p1203_p11, %p1199_p8 }
 0x2a4   : > { %1207 = shalt.err (!%p1204_p12)
}
 0x2a5   : > { %s1245_s15 = smov 128   ;;  %s1246_s16 = smov 8  }
 0x2a6   : > { %1119 = dma.vmem_to_hbm [thread:$0]  (%p1325_p5), %s1432_s14, 2048, %s1430_s17, %s1438_s28, %s1245_s15, %s1245_s15, %s1246_s16  }
 0x2a7 PF: > { %p1125_p13 = scmp.ge.s32.totalorder %s1242_s27, 2  ;;  %s904_s18 = sand.u32 1, %s1230_s24  }
 0x2a8   : > { %s905_s19 = scalar_lea.sflag [#allocation3], %s904_s18 }
 0x2a9   : > { %p1122_p0 = pnand %p1125_p13, %p1329_p6 }
 0x2ab   : > { %p1123_p1 = pneg %p1122_p0 }
 0x2ad   : > { %1225 = dma.done.wait (%p1123_p1), %s905_s19, 2048  }
 0x2ae   : > { %1227 = vsyncadd (%p1123_p1), %s905_s19, 4294965248  ;;  %p17_p2 = scmp.ge.s32.totalorder %s1312_s30, 4   ;;  %s1488_s24 = smov %s1234_s25 }
 0x2af   : > { %s1489_s25 = smov %s1238_s26  ;;  %s1490_s26 = smov %s1323_s10 }
 0x2b0   : > { %s1491_s27 = smov %s1312_s30  ;;  %19 = sbr.rel (!%p17_p2) target bundleno = 3 (0x3), region = 83 }
 0x2b5   :  { %910 = vsyncpa [#allocation3], 1 }
 0x2b6   :  { %912 = vsyncpa [#allocation3 + $0x1], 1 }

</bundles_post_ra>
